<compile_context>
chip_gen: v6e
topology: v6e:2x2x1
jax: 0.10.0
libtpu: 0.0.40
codegen_flags: <defaults>
</compile_context>

<pallas_src>
import jax
import jax.numpy as jnp
from jax.experimental import pallas as pl
from jax.experimental.pallas import tpu as pltpu

_EPS = 1e-15


def _round_up(x, m):
    return ((x + m - 1) // m) * m


def _vmem_capacity_bytes():
    try:
        return int(pltpu.get_tpu_info().vmem_capacity_bytes)
    except Exception:  # conservative (v7x-sized) fallback
        return 64 << 20


def _champ_kernel(pred_full_ref, pred_i_ref, tgt_ref, dist_ref, w0_ref, out_ref):
    i = pl.program_id(1)
    ti = dist_ref.shape[0]                                 # label rows handled this step

    tgt = tgt_ref[...]                                     # (TB, Lpad), {0,1} targets

    # term1 over this tile of label rows i: softplus(x) == -log(1 - sigmoid(x)).
    x_i = pred_i_ref[:, :ti]                               # (TB, TI) logits (static slice)
    term1 = jnp.maximum(x_i, 0.0) + jnp.log(1.0 + jnp.exp(-jnp.abs(x_i)))

    # a[b,r,j] = dist_or_inf[i*TI + r, j] where tgt[b,j] == 1 else +inf.
    # Single select -> the only live (TB, TI, Lpad) tensor (binary-target assumption).
    a = jnp.where(tgt[:, None, :] != 0.0, dist_ref[...][None, :, :], jnp.inf)
    row_min = jnp.min(a, axis=2, keepdims=True)            # lane reduce (XLU)
    # Fused: argmin one-hot (ties kept; inf==inf handles empty-target rows) -> W0 -> row sum.
    rowsum_w = jnp.sum(
        jnp.where(a == row_min, w0_ref[...][None, :, :], 0.0), axis=2)   # (TB, TI)

    part1 = jnp.sum(term1 * rowsum_w, axis=1, keepdims=True)             # (TB, 1)

    @pl.when(i == 0)
    def _():
        # term2 * tgt summed over all labels j, once per batch tile; softplus(-x).
        x = pred_full_ref[...]
        term2 = jnp.maximum(-x, 0.0) + jnp.log(1.0 + jnp.exp(-jnp.abs(x)))
        out_ref[...] = jnp.broadcast_to(
            jnp.sum(term2 * tgt, axis=1, keepdims=True), out_ref.shape)

    out_ref[...] += jnp.broadcast_to(part1, out_ref.shape)


def champ_loss(prediction, target, distance_matrix, normalised_distance, beta):
    """CHAMP hard-loss forward. prediction/target: (B, L) (binary targets); matrices: (L, L)."""
    B, L = prediction.shape
    cap = _vmem_capacity_bytes()

    # --- batch tiling: bigger tiles on 128-MiB parts (v5e/v6e); keep >= 2 tiles when the
    # batch allows so v7x's two TensorCores can split the "parallel" axis. ----------------
    tb = 16 if cap >= (100 << 20) else 8
    if B > 8 and _round_up(B, 8) < 2 * tb:
        tb = max(8, (_round_up(B, 8) // 2) // 8 * 8)
    Bp = _round_up(B, tb)
    nt = Bp // tb

    # --- label tiling: keep dist/W0 fully resident (i padded only to 8) whenever the
    # (TB, Li, Lpj) intermediate fits; otherwise stream (TI, Lpad) slabs down an inner grid
    # axis so the live 3-D tile stays bounded (v7x: 64 MiB VMEM). --------------------------
    Lpj = _round_up(L, 128)
    li8 = _round_up(L, 8)
    usable = cap - (8 << 20)

    def _footprint(ti_, lpad_, nbuf_):
        tile3d = 3 * tb * ti_ * lpad_ * 4          # a + fused select temp + slack
        io = (3 * 2 * tb * lpad_ * 4               # pred (x2) + tgt, double-buffered
              + nbuf_ * 2 * ti_ * lpad_ * 4        # dist + W0
              + 2 * tb * 128 * 4)                  # output block
        return tile3d + io

    if _footprint(li8, Lpj, 1) <= usable:
        ti, n_i, lpad = li8, 1, Lpj                # resident dist/W0, decoupled i/j padding
    else:
        ti = 512
        while ti > 128 and _footprint(ti, _round_up(L, ti), 2) > usable:
            ti //= 2
        lpad = _round_up(L, ti)
        n_i = lpad // ti
    li_pad = li8 if n_i == 1 else lpad

    # --- wrapper-side label-table precompute (constant per label tree). -------------------
    dm = distance_matrix.astype(jnp.float32)
    nd = normalised_distance.astype(jnp.float32)
    dist1 = jnp.where(dm > -1.0, dm + 1.0, 0.0)
    dist_or_inf = jnp.where(dist1 >= 1.0, dist1, jnp.inf)     # "< 1 -> sentinel" folded in
    w0 = jnp.where(nd != 0.0, beta * nd + 1.0, 0.0)

    # Padding: padded j columns are never selected (tgt pad == 0 -> +inf sentinel); padded i
    # rows contribute 0 (W0 pad rows == 0); padded batch rows are sliced off before the mean.
    pred_p = jnp.zeros((Bp, lpad), jnp.float32).at[:B, :L].set(prediction.astype(jnp.float32))
    tgt_p = jnp.zeros((Bp, lpad), jnp.float32).at[:B, :L].set(target.astype(jnp.float32))
    dist_p = jnp.full((li_pad, lpad), jnp.inf, jnp.float32).at[:L, :L].set(dist_or_inf)
    w0_p = jnp.zeros((li_pad, lpad), jnp.float32).at[:L, :L].set(w0)

    # --- chip-aware VMEM budget (never above physical capacity). --------------------------
    nbuf = 1 if n_i == 1 else 2
    vmem_limit = int(min(cap - (4 << 20),
                         max(_footprint(ti, lpad, nbuf) + (4 << 20), 16 << 20)))

    def _run(single_buffer):
        batch_spec = pl.BlockSpec((tb, lpad), lambda b, i: (b, 0))   # resident across i
        if n_i == 1:
            kw = {"pipeline_mode": pl.Buffered(1)} if single_buffer else {}
            pred_i_spec = pl.BlockSpec((tb, lpad), lambda b, i: (b, 0))
            dist_spec = pl.BlockSpec((ti, lpad), lambda b, i: (0, 0), **kw)
            w0_spec = pl.BlockSpec((ti, lpad), lambda b, i: (0, 0), **kw)
        else:
            pred_i_spec = pl.BlockSpec((tb, ti), lambda b, i: (b, i))
            dist_spec = pl.BlockSpec((ti, lpad), lambda b, i: (i, 0))
            w0_spec = pl.BlockSpec((ti, lpad), lambda b, i: (i, 0))
        return pl.pallas_call(
            _champ_kernel,
            out_shape=jax.ShapeDtypeStruct((Bp, 128), jnp.float32),
            grid=(nt, n_i),
            in_specs=[batch_spec, pred_i_spec, batch_spec, dist_spec, w0_spec],
            out_specs=pl.BlockSpec((tb, 128), lambda b, i: (b, 0)),
            compiler_params=pltpu.CompilerParams(
                dimension_semantics=("parallel", "arbitrary"),
                vmem_limit_bytes=vmem_limit,
            ),
        )(pred_p, pred_p, tgt_p, dist_p, w0_p)

    if n_i == 1:
        try:
            out = _run(single_buffer=True)        # Buffered(1) on constant dist/W0 blocks
        except Exception:                         # conservative: fall back to default buffering
            out = _run(single_buffer=False)
    else:
        out = _run(single_buffer=False)

    return jnp.mean(out[:B, 0])


def champ_ref(prediction, target, distance_matrix, normalised_distance, beta):
    """Pure-JAX mirror of the PyTorch forward (for verification)."""
    pred = jax.nn.sigmoid(prediction.astype(jnp.float32))
    tgt = target.astype(jnp.float32)
    max_dist = jnp.max(distance_matrix)
    dist = jnp.where(distance_matrix[None] > -1.0, distance_matrix[None] + 1.0, 0.0)
    dist = tgt[:, None, :] * dist
    dist = jnp.where(dist < 1.0, max_dist + 2.0, dist)
    dist = jnp.where(dist == jnp.min(dist, axis=2, keepdims=True), 1.0, 0.0)
    dist = jnp.where(dist > 0.0, normalised_distance[None], 0.0)
    dist = jnp.where(dist != 0.0, beta * dist + 1.0, 0.0)
    term1 = 1.0 - pred
    term1 = jnp.where(term1 != 0.0, -jnp.log(term1 + _EPS), 0.0)
    term2 = jnp.where(pred != 0.0, -jnp.log(pred + _EPS), 0.0)
    eye = jnp.eye(prediction.shape[1], dtype=jnp.float32)
    correct_ids = tgt[:, None, :] * eye[None]
    loss = (
        jnp.einsum("bi,bij->bj", term1, dist)
        + jnp.einsum("bi,bij->bj", term2, correct_ids)
    )
    return jnp.mean(jnp.sum(loss, axis=1))


def make_tree_distance_matrix(n_lab, group_size=4):
    """Synthetic label-tree distances: leaves grouped under parents under a root.
    Same label: 0; same group (via parent): 2; different group (via root): 4."""
    idx = jnp.arange(n_lab)
    same_group = (idx[:, None] // group_size) == (idx[None, :] // group_size)
    diag = idx[:, None] == idx[None, :]
    return jnp.where(diag, 0.0, jnp.where(same_group, 2.0, 4.0)).astype(jnp.float32)


if __name__ == "__main__":
    B, L = 4, 16
    beta = 0.5

    key = jax.random.PRNGKey(0)
    k1, k2 = jax.random.split(key)
    prediction = jax.random.normal(k1, (B, L), dtype=jnp.float32)        # logits
    target = (jax.random.uniform(k2, (B, L)) < 0.3).astype(jnp.float32)  # multi-hot labels

    distance_matrix = make_tree_distance_matrix(L)
    normalised_distance = (
        (distance_matrix / (jnp.max(distance_matrix) + _EPS) + 1.0) ** 2 - 1.0
    ).astype(jnp.float32)

    loss = champ_loss(prediction, target, distance_matrix, normalised_distance, beta)
    jax.block_until_ready(loss)

    ref = champ_ref(prediction, target, distance_matrix, normalised_distance, beta)
    assert jnp.allclose(loss, ref, rtol=1e-4, atol=1e-4), (float(loss), float(ref))

    print("KERNEL_OK")
</pallas_src>

<mosaic_0001>
module attributes {stable_mosaic.version = 11 : i64} {
  func.func @_champ_kernel(%arg0: i32, %arg1: i32, %arg2: memref<8x128xf32, #tpu.memory_space<vmem>>, %arg3: memref<8x128xf32, #tpu.memory_space<vmem>>, %arg4: memref<8x128xf32, #tpu.memory_space<vmem>>, %arg5: memref<16x128xf32, #tpu.memory_space<vmem>>, %arg6: memref<16x128xf32, #tpu.memory_space<vmem>>, %arg7: memref<8x128xf32, #tpu.memory_space<vmem>>) attributes {dimension_semantics = [#tpu.dimension_semantics<parallel>, #tpu.dimension_semantics<arbitrary>], iteration_bounds = array<i64: 1, 1>, scalar_prefetch = 0 : i64, scratch_operands = 0 : i64, tpu.core_type = #tpu.core_type<tc>, window_params = [{transform_indices = @transform_0, window_bounds = array<i64: 8, 128>}, {transform_indices = @transform_1, window_bounds = array<i64: 8, 128>}, {transform_indices = @transform_2, window_bounds = array<i64: 8, 128>}, {pipeline_mode = #tpu.pipeline_mode<synchronous>, transform_indices = @transform_3, window_bounds = array<i64: 16, 128>}, {pipeline_mode = #tpu.pipeline_mode<synchronous>, transform_indices = @transform_4, window_bounds = array<i64: 16, 128>}, {transform_indices = @transform_5, window_bounds = array<i64: 8, 128>}]} {
    %c0 = arith.constant 0 : index
    %c0_0 = arith.constant 0 : index
    %0 = vector.load %arg4[%c0, %c0_0] : memref<8x128xf32, #tpu.memory_space<vmem>>, vector<8x128xf32>
    %c0_1 = arith.constant 0 : index
    %c0_2 = arith.constant 0 : index
    %1 = vector.load %arg3[%c0_1, %c0_2] : memref<8x128xf32, #tpu.memory_space<vmem>>, vector<8x16xf32>
    %cst = arith.constant 0.000000e+00 : f32
    %2 = vector.broadcast %cst : f32 to vector<8x16xf32>
    %3 = arith.maximumf %1, %2 : vector<8x16xf32>
    %4 = math.absf %1 : vector<8x16xf32>
    %cst_3 = arith.constant 0.000000e+00 : f32
    %5 = vector.broadcast %cst_3 : f32 to vector<8x16xf32>
    %6 = arith.subf %5, %4 : vector<8x16xf32>
    %7 = math.exp %6 : vector<8x16xf32>
    %cst_4 = arith.constant 1.000000e+00 : f32
    %8 = vector.broadcast %cst_4 : f32 to vector<8x16xf32>
    %9 = arith.addf %8, %7 : vector<8x16xf32>
    %10 = math.log %9 : vector<8x16xf32>
    %11 = arith.addf %3, %10 : vector<8x16xf32>
    %12 = vector.shape_cast %0 : vector<8x128xf32> to vector<8x1x128xf32>
    %cst_5 = arith.constant 0.000000e+00 : f32
    %13 = vector.broadcast %cst_5 : f32 to vector<8x1x128xf32>
    %14 = arith.cmpf one, %12, %13 : vector<8x1x128xf32>
    %c0_6 = arith.constant 0 : index
    %c0_7 = arith.constant 0 : index
    %15 = vector.load %arg5[%c0_6, %c0_7] : memref<16x128xf32, #tpu.memory_space<vmem>>, vector<16x128xf32>
    %16 = vector.shape_cast %15 : vector<16x128xf32> to vector<1x16x128xf32>
    %cst_8 = arith.constant 0x7F800000 : f32
    %17 = vector.shape_cast %14 : vector<8x1x128xi1> to vector<8x1x128xi1>
    %18 = vector.broadcast %17 : vector<8x1x128xi1> to vector<8x16x128xi1>
    %19 = vector.shape_cast %16 : vector<1x16x128xf32> to vector<1x16x128xf32>
    %20 = vector.broadcast %19 : vector<1x16x128xf32> to vector<8x16x128xf32>
    %21 = vector.broadcast %cst_8 : f32 to vector<8x16x128xf32>
    %22 = arith.select %18, %20, %21 : vector<8x16x128xi1>, vector<8x16x128xf32>
    %cst_9 = arith.constant dense<0x7F800000> : vector<8x16xf32>
    %23 = vector.multi_reduction <minimumf>, %22, %cst_9 [2] : vector<8x16x128xf32> to vector<8x16xf32>
    %24 = vector.shape_cast %23 : vector<8x16xf32> to vector<8x16x1xf32>
    %25 = vector.broadcast %24 : vector<8x16x1xf32> to vector<8x16x128xf32>
    %26 = arith.cmpf oeq, %22, %25 : vector<8x16x128xf32>
    %c0_10 = arith.constant 0 : index
    %c0_11 = arith.constant 0 : index
    %27 = vector.load %arg6[%c0_10, %c0_11] : memref<16x128xf32, #tpu.memory_space<vmem>>, vector<16x128xf32>
    %28 = vector.shape_cast %27 : vector<16x128xf32> to vector<1x16x128xf32>
    %cst_12 = arith.constant 0.000000e+00 : f32
    %29 = vector.shape_cast %28 : vector<1x16x128xf32> to vector<1x16x128xf32>
    %30 = vector.broadcast %29 : vector<1x16x128xf32> to vector<8x16x128xf32>
    %31 = vector.broadcast %cst_12 : f32 to vector<8x16x128xf32>
    %32 = arith.select %26, %30, %31 : vector<8x16x128xi1>, vector<8x16x128xf32>
    %cst_13 = arith.constant dense<0.000000e+00> : vector<8x16xf32>
    %33 = vector.multi_reduction <add>, %32, %cst_13 [2] : vector<8x16x128xf32> to vector<8x16xf32>
    %34 = arith.mulf %11, %33 : vector<8x16xf32>
    %cst_14 = arith.constant dense<0.000000e+00> : vector<8xf32>
    %35 = vector.multi_reduction <add>, %34, %cst_14 [1] : vector<8x16xf32> to vector<8xf32>
    %36 = vector.shape_cast %35 : vector<8xf32> to vector<8x1xf32>
    %c0_i32 = arith.constant 0 : i32
    %37 = arith.cmpi eq, %arg1, %c0_i32 : i32
    %38 = arith.extui %37 : i1 to i32
    %c0_i32_15 = arith.constant 0 : i32
    %39 = arith.cmpi ne, %38, %c0_i32_15 : i32
    scf.if %39 {
      %c0_20 = arith.constant 0 : index
      %c0_21 = arith.constant 0 : index
      %45 = vector.load %arg2[%c0_20, %c0_21] : memref<8x128xf32, #tpu.memory_space<vmem>>, vector<8x128xf32>
      %cst_22 = arith.constant 0.000000e+00 : f32
      %46 = vector.broadcast %cst_22 : f32 to vector<8x128xf32>
      %47 = arith.subf %46, %45 : vector<8x128xf32>
      %cst_23 = arith.constant 0.000000e+00 : f32
      %48 = vector.broadcast %cst_23 : f32 to vector<8x128xf32>
      %49 = arith.maximumf %47, %48 : vector<8x128xf32>
      %50 = math.absf %45 : vector<8x128xf32>
      %cst_24 = arith.constant 0.000000e+00 : f32
      %51 = vector.broadcast %cst_24 : f32 to vector<8x128xf32>
      %52 = arith.subf %51, %50 : vector<8x128xf32>
      %53 = math.exp %52 : vector<8x128xf32>
      %cst_25 = arith.constant 1.000000e+00 : f32
      %54 = vector.broadcast %cst_25 : f32 to vector<8x128xf32>
      %55 = arith.addf %54, %53 : vector<8x128xf32>
      %56 = math.log %55 : vector<8x128xf32>
      %57 = arith.addf %49, %56 : vector<8x128xf32>
      %58 = arith.mulf %57, %0 : vector<8x128xf32>
      %cst_26 = arith.constant dense<0.000000e+00> : vector<8xf32>
      %59 = vector.multi_reduction <add>, %58, %cst_26 [1] : vector<8x128xf32> to vector<8xf32>
      %60 = vector.shape_cast %59 : vector<8xf32> to vector<8x1xf32>
      %61 = vector.shape_cast %60 : vector<8x1xf32> to vector<8x1xf32>
      %62 = vector.broadcast %61 : vector<8x1xf32> to vector<8x128xf32>
      %c0_27 = arith.constant 0 : index
      %c0_28 = arith.constant 0 : index
      %63 = vector.load %arg7[%c0_27, %c0_28] : memref<8x128xf32, #tpu.memory_space<vmem>>, vector<8x128xf32>
      tpu.vector_store %arg7[%c0_27, %c0_28], %62 {strides = array<i32>} : memref<8x128xf32, #tpu.memory_space<vmem>>, vector<8x128xf32>,
    } else {
    }
    %c0_16 = arith.constant 0 : index
    %c0_17 = arith.constant 0 : index
    %40 = vector.load %arg7[%c0_16, %c0_17] : memref<8x128xf32, #tpu.memory_space<vmem>>, vector<8x128xf32>
    %41 = vector.shape_cast %36 : vector<8x1xf32> to vector<8x1xf32>
    %42 = vector.broadcast %41 : vector<8x1xf32> to vector<8x128xf32>
    %43 = arith.addf %40, %42 : vector<8x128xf32>
    %c0_18 = arith.constant 0 : index
    %c0_19 = arith.constant 0 : index
    %44 = vector.load %arg7[%c0_18, %c0_19] : memref<8x128xf32, #tpu.memory_space<vmem>>, vector<8x128xf32>
    tpu.vector_store %arg7[%c0_18, %c0_19], %43 {strides = array<i32>} : memref<8x128xf32, #tpu.memory_space<vmem>>, vector<8x128xf32>,
    return
  }
  func.func @transform_0(%arg0: i32, %arg1: i32) -> (i32, i32) {
    %c0_i32 = arith.constant 0 : i32
    %c0_i32_0 = arith.constant 0 : i32
    return %arg0, %c0_i32 : i32, i32
  }
  func.func @transform_1(%arg0: i32, %arg1: i32) -> (i32, i32) {
    %c0_i32 = arith.constant 0 : i32
    %c0_i32_0 = arith.constant 0 : i32
    return %arg0, %c0_i32 : i32, i32
  }
  func.func @transform_2(%arg0: i32, %arg1: i32) -> (i32, i32) {
    %c0_i32 = arith.constant 0 : i32
    %c0_i32_0 = arith.constant 0 : i32
    return %arg0, %c0_i32 : i32, i32
  }
  func.func @transform_3(%arg0: i32, %arg1: i32) -> (i32, i32) {
    %c0_i32 = arith.constant 0 : i32
    %c0_i32_0 = arith.constant 0 : i32
    %c0_i32_1 = arith.constant 0 : i32
    return %c0_i32, %c0_i32_0 : i32, i32
  }
  func.func @transform_4(%arg0: i32, %arg1: i32) -> (i32, i32) {
    %c0_i32 = arith.constant 0 : i32
    %c0_i32_0 = arith.constant 0 : i32
    %c0_i32_1 = arith.constant 0 : i32
    return %c0_i32, %c0_i32_0 : i32, i32
  }
  func.func @transform_5(%arg0: i32, %arg1: i32) -> (i32, i32) {
    %c0_i32 = arith.constant 0 : i32
    %c0_i32_0 = arith.constant 0 : i32
    return %arg0, %c0_i32 : i32, i32
  }
}

module attributes {stable_mosaic.version = 11 : i64} {
  func.func @_champ_kernel(%arg0: i32, %arg1: i32, %arg2: memref<8x128xf32, #tpu.memory_space<vmem>>, %arg3: memref<8x128xf32, #tpu.memory_space<vmem>>, %arg4: memref<8x128xf32, #tpu.memory_space<vmem>>, %arg5: memref<16x128xf32, #tpu.memory_space<vmem>>, %arg6: memref<16x128xf32, #tpu.memory_space<vmem>>, %arg7: memref<8x128xf32, #tpu.memory_space<vmem>>) attributes {dimension_semantics = [#tpu.dimension_semantics<parallel>, #tpu.dimension_semantics<arbitrary>], iteration_bounds = array<i64: 1, 1>, scalar_prefetch = 0 : i64, scratch_operands = 0 : i64, tpu.core_type = #tpu.core_type<tc>, window_params = [{transform_indices = @transform_0, window_bounds = array<i64: 8, 128>}, {transform_indices = @transform_1, window_bounds = array<i64: 8, 128>}, {transform_indices = @transform_2, window_bounds = array<i64: 8, 128>}, {pipeline_mode = #tpu.pipeline_mode<synchronous>, transform_indices = @transform_3, window_bounds = array<i64: 16, 128>}, {pipeline_mode = #tpu.pipeline_mode<synchronous>, transform_indices = @transform_4, window_bounds = array<i64: 16, 128>}, {transform_indices = @transform_5, window_bounds = array<i64: 8, 128>}]} {
    %c0 = arith.constant 0 : index
    %c0_0 = arith.constant 0 : index
    %0 = vector.load %arg4[%c0, %c0_0] : memref<8x128xf32, #tpu.memory_space<vmem>>, vector<8x128xf32>
    %c0_1 = arith.constant 0 : index
    %c0_2 = arith.constant 0 : index
    %1 = vector.load %arg3[%c0_1, %c0_2] : memref<8x128xf32, #tpu.memory_space<vmem>>, vector<8x16xf32>
    %cst = arith.constant 0.000000e+00 : f32
    %2 = vector.broadcast %cst : f32 to vector<8x16xf32>
    %3 = arith.maximumf %1, %2 : vector<8x16xf32>
    %4 = math.absf %1 : vector<8x16xf32>
    %cst_3 = arith.constant 0.000000e+00 : f32
    %5 = vector.broadcast %cst_3 : f32 to vector<8x16xf32>
    %6 = arith.subf %5, %4 : vector<8x16xf32>
    %7 = math.exp %6 : vector<8x16xf32>
    %cst_4 = arith.constant 1.000000e+00 : f32
    %8 = vector.broadcast %cst_4 : f32 to vector<8x16xf32>
    %9 = arith.addf %8, %7 : vector<8x16xf32>
    %10 = math.log %9 : vector<8x16xf32>
    %11 = arith.addf %3, %10 : vector<8x16xf32>
    %12 = vector.shape_cast %0 : vector<8x128xf32> to vector<8x1x128xf32>
    %cst_5 = arith.constant 0.000000e+00 : f32
    %13 = vector.broadcast %cst_5 : f32 to vector<8x1x128xf32>
    %14 = arith.cmpf one, %12, %13 : vector<8x1x128xf32>
    %c0_6 = arith.constant 0 : index
    %c0_7 = arith.constant 0 : index
    %15 = vector.load %arg5[%c0_6, %c0_7] : memref<16x128xf32, #tpu.memory_space<vmem>>, vector<16x128xf32>
    %16 = vector.shape_cast %15 : vector<16x128xf32> to vector<1x16x128xf32>
    %cst_8 = arith.constant 0x7F800000 : f32
    %17 = vector.shape_cast %14 : vector<8x1x128xi1> to vector<8x1x128xi1>
    %18 = vector.broadcast %17 : vector<8x1x128xi1> to vector<8x16x128xi1>
    %19 = vector.shape_cast %16 : vector<1x16x128xf32> to vector<1x16x128xf32>
    %20 = vector.broadcast %19 : vector<1x16x128xf32> to vector<8x16x128xf32>
    %21 = vector.broadcast %cst_8 : f32 to vector<8x16x128xf32>
    %22 = arith.select %18, %20, %21 : vector<8x16x128xi1>, vector<8x16x128xf32>
    %cst_9 = arith.constant dense<0x7F800000> : vector<8x16xf32>
    %23 = vector.multi_reduction <minimumf>, %22, %cst_9 [2] : vector<8x16x128xf32> to vector<8x16xf32>
    %24 = vector.shape_cast %23 : vector<8x16xf32> to vector<8x16x1xf32>
    %25 = vector.broadcast %24 : vector<8x16x1xf32> to vector<8x16x128xf32>
    %26 = arith.cmpf oeq, %22, %25 : vector<8x16x128xf32>
    %c0_10 = arith.constant 0 : index
    %c0_11 = arith.constant 0 : index
    %27 = vector.load %arg6[%c0_10, %c0_11] : memref<16x128xf32, #tpu.memory_space<vmem>>, vector<16x128xf32>
    %28 = vector.shape_cast %27 : vector<16x128xf32> to vector<1x16x128xf32>
    %cst_12 = arith.constant 0.000000e+00 : f32
    %29 = vector.shape_cast %28 : vector<1x16x128xf32> to vector<1x16x128xf32>
    %30 = vector.broadcast %29 : vector<1x16x128xf32> to vector<8x16x128xf32>
    %31 = vector.broadcast %cst_12 : f32 to vector<8x16x128xf32>
    %32 = arith.select %26, %30, %31 : vector<8x16x128xi1>, vector<8x16x128xf32>
    %cst_13 = arith.constant dense<0.000000e+00> : vector<8x16xf32>
    %33 = vector.multi_reduction <add>, %32, %cst_13 [2] : vector<8x16x128xf32> to vector<8x16xf32>
    %34 = arith.mulf %11, %33 : vector<8x16xf32>
    %cst_14 = arith.constant dense<0.000000e+00> : vector<8xf32>
    %35 = vector.multi_reduction <add>, %34, %cst_14 [1] : vector<8x16xf32> to vector<8xf32>
    %36 = vector.shape_cast %35 : vector<8xf32> to vector<8x1xf32>
    %c0_i32 = arith.constant 0 : i32
    %37 = arith.cmpi eq, %arg1, %c0_i32 : i32
    %38 = arith.extui %37 : i1 to i32
    %c0_i32_15 = arith.constant 0 : i32
    %39 = arith.cmpi ne, %38, %c0_i32_15 : i32
    scf.if %39 {
      %c0_20 = arith.constant 0 : index
      %c0_21 = arith.constant 0 : index
      %45 = vector.load %arg2[%c0_20, %c0_21] : memref<8x128xf32, #tpu.memory_space<vmem>>, vector<8x128xf32>
      %cst_22 = arith.constant 0.000000e+00 : f32
      %46 = vector.broadcast %cst_22 : f32 to vector<8x128xf32>
      %47 = arith.subf %46, %45 : vector<8x128xf32>
      %cst_23 = arith.constant 0.000000e+00 : f32
      %48 = vector.broadcast %cst_23 : f32 to vector<8x128xf32>
      %49 = arith.maximumf %47, %48 : vector<8x128xf32>
      %50 = math.absf %45 : vector<8x128xf32>
      %cst_24 = arith.constant 0.000000e+00 : f32
      %51 = vector.broadcast %cst_24 : f32 to vector<8x128xf32>
      %52 = arith.subf %51, %50 : vector<8x128xf32>
      %53 = math.exp %52 : vector<8x128xf32>
      %cst_25 = arith.constant 1.000000e+00 : f32
      %54 = vector.broadcast %cst_25 : f32 to vector<8x128xf32>
      %55 = arith.addf %54, %53 : vector<8x128xf32>
      %56 = math.log %55 : vector<8x128xf32>
      %57 = arith.addf %49, %56 : vector<8x128xf32>
      %58 = arith.mulf %57, %0 : vector<8x128xf32>
      %cst_26 = arith.constant dense<0.000000e+00> : vector<8xf32>
      %59 = vector.multi_reduction <add>, %58, %cst_26 [1] : vector<8x128xf32> to vector<8xf32>
      %60 = vector.shape_cast %59 : vector<8xf32> to vector<8x1xf32>
      %61 = vector.shape_cast %60 : vector<8x1xf32> to vector<8x1xf32>
      %62 = vector.broadcast %61 : vector<8x1xf32> to vector<8x128xf32>
      %c0_27 = arith.constant 0 : index
      %c0_28 = arith.constant 0 : index
      %63 = vector.load %arg7[%c0_27, %c0_28] : memref<8x128xf32, #tpu.memory_space<vmem>>, vector<8x128xf32>
      tpu.vector_store %arg7[%c0_27, %c0_28], %62 {strides = array<i32>} : memref<8x128xf32, #tpu.memory_space<vmem>>, vector<8x128xf32>,
    } else {
    }
    %c0_16 = arith.constant 0 : index
    %c0_17 = arith.constant 0 : index
    %40 = vector.load %arg7[%c0_16, %c0_17] : memref<8x128xf32, #tpu.memory_space<vmem>>, vector<8x128xf32>
    %41 = vector.shape_cast %36 : vector<8x1xf32> to vector<8x1xf32>
    %42 = vector.broadcast %41 : vector<8x1xf32> to vector<8x128xf32>
    %43 = arith.addf %40, %42 : vector<8x128xf32>
    %c0_18 = arith.constant 0 : index
    %c0_19 = arith.constant 0 : index
    %44 = vector.load %arg7[%c0_18, %c0_19] : memref<8x128xf32, #tpu.memory_space<vmem>>, vector<8x128xf32>
    tpu.vector_store %arg7[%c0_18, %c0_19], %43 {strides = array<i32>} : memref<8x128xf32, #tpu.memory_space<vmem>>, vector<8x128xf32>,
    return
  }
  func.func @transform_0(%arg0: i32, %arg1: i32) -> (i32, i32) {
    %c0_i32 = arith.constant 0 : i32
    %c0_i32_0 = arith.constant 0 : i32
    return %arg0, %c0_i32 : i32, i32
  }
  func.func @transform_1(%arg0: i32, %arg1: i32) -> (i32, i32) {
    %c0_i32 = arith.constant 0 : i32
    %c0_i32_0 = arith.constant 0 : i32
    return %arg0, %c0_i32 : i32, i32
  }
  func.func @transform_2(%arg0: i32, %arg1: i32) -> (i32, i32) {
    %c0_i32 = arith.constant 0 : i32
    %c0_i32_0 = arith.constant 0 : i32
    return %arg0, %c0_i32 : i32, i32
  }
  func.func @transform_3(%arg0: i32, %arg1: i32) -> (i32, i32) {
    %c0_i32 = arith.constant 0 : i32
    %c0_i32_0 = arith.constant 0 : i32
    %c0_i32_1 = arith.constant 0 : i32
    return %c0_i32, %c0_i32_0 : i32, i32
  }
  func.func @transform_4(%arg0: i32, %arg1: i32) -> (i32, i32) {
    %c0_i32 = arith.constant 0 : i32
    %c0_i32_0 = arith.constant 0 : i32
    %c0_i32_1 = arith.constant 0 : i32
    return %c0_i32, %c0_i32_0 : i32, i32
  }
  func.func @transform_5(%arg0: i32, %arg1: i32) -> (i32, i32) {
    %c0_i32 = arith.constant 0 : i32
    %c0_i32_0 = arith.constant 0 : i32
    return %arg0, %c0_i32 : i32, i32
  }
}

</mosaic_0001>

<bundles_post_ra>
// kernel: tpu_custom_call.1
= control target key start
LH: loop header
LB: loop body
LE: loop exit
PB: predicated region body
PF: predicated region fallthrough
CT: control target
= control target key end

     0   :  { %10 = vsyncpa [#allocation3], 0  ;;  %s796_s0 = inlined_call_operand.hbm [shape: f32[8,128], index: 0, kind: input, shape index: {}]   ;;  %s797_s1 = inlined_call_operand.hbm [shape: f32[8,128], index: 1, kind: input, shape index: {}]   ;;  %s798_s2 = inlined_call_operand.hbm [shape: f32[8,128], index: 2, kind: input, shape index: {}]   ;;  %s799_s3 = inlined_call_operand.hbm [shape: f32[16,128], index: 3, kind: input, shape index: {}]   ;;  %s800_s4 = inlined_call_operand.hbm [shape: f32[16,128], index: 4, kind: input, shape index: {}]   ;;  %s801_s5 = inlined_call_operand.hbm [shape: f32[8,128], index: 5, kind: output, shape index: {}]  }
   0x1   :  { %11 = vsyncpa [#allocation6], 0 }
   0x2   :  { %12 = vsyncpa [#allocation9], 0 }
   0x3   :  { %13 = vsyncpa [#allocation4], 0  ;;  %s622_s18 = smov [#allocation5]   ;;  %s623_s20 = smov [#allocation8]  }
   0x4   :  { %s30_s19 = sshll.u32 %s622_s18, 4  ;;  %s49_s21 = sshll.u32 %s623_s20, 4  ;;  %s31_s19 = int_to_ptr.vmem [resolvable:$true] %s30_s19  ;;  %s50_s21 = int_to_ptr.vmem [resolvable:$true] %s49_s21 }
   0x5   :  { %s502_s22 = scalar_lea.vmem %s31_s19, 128  ;;  %p507_p1 = scmp.lt.s32.totalorder %s31_s19, %s31_s19 }
   0x6   :  { %p503_p0 = scmp.ne.s32.totalorder %s31_s19, %s502_s22  ;;  %p508_p2 = scmp.lt.s32.totalorder %s502_s22, %s502_s22 }
   0x8   :  { %p509_p3 = por %p508_p2, %p507_p1 }
   0xa   :  { %p510_p4 = pnand %p509_p3, %p503_p0 }
   0xc   :  { %513 = shalt.err (!%p510_p4)
}
   0xd   :  { %33 = dma.hbm_to_vmem [thread:$0]  %s797_s1, 128, %s31_s19, [#allocation6]  }
   0xe   :  { %s522_s25 = scalar_lea.vmem %s50_s21, 256  ;;  %p527_p6 = scmp.lt.s32.totalorder %s50_s21, %s50_s21 }
   0xf   :  { %p523_p5 = scmp.ne.s32.totalorder %s50_s21, %s522_s25  ;;  %p528_p7 = scmp.lt.s32.totalorder %s522_s25, %s522_s25 }
  0x11   :  { %p529_p8 = por %p528_p7, %p527_p6 }
  0x13   :  { %p530_p9 = pnand %p529_p8, %p523_p5 }
  0x15   :  { %533 = shalt.err (!%p530_p9)
}
  0x16   :  { %s624_s26 = smov 128   ;;  %s625_s27 = smov 8  }
  0x17   :  { %55 = dma.hbm_to_vmem [thread:$0]  %s799_s3, 256, %s50_s21, [#allocation9], %s624_s26, %s624_s26, %s625_s27  }
  0x18   :  { %s626_s30 = smov [#allocation2]   ;;  %s627_s7 = smov [#allocation7]  }
  0x19   :  { %s20_s6 = sshll.u32 %s626_s30, 4  ;;  %s40_s1 = sshll.u32 %s627_s7, 4  ;;  %s21_s6 = int_to_ptr.vmem [resolvable:$true] %s20_s6  ;;  %s41_s1 = int_to_ptr.vmem [resolvable:$true] %s40_s1 }
  0x1a   :  { %s542_s8 = scalar_lea.vmem %s21_s6, 128  ;;  %p547_p11 = scmp.lt.s32.totalorder %s21_s6, %s21_s6 }
  0x1b   :  { %p543_p10 = scmp.ne.s32.totalorder %s21_s6, %s542_s8  ;;  %p548_p12 = scmp.lt.s32.totalorder %s542_s8, %s542_s8 }
  0x1d   :  { %p549_p13 = por %p548_p12, %p547_p11 }
  0x1f   :  { %p550_p0 = pnand %p549_p13, %p543_p10 }
  0x21   :  { %553 = shalt.err (!%p550_p0)
}
  0x22   :  { %23 = dma.hbm_to_vmem [thread:$0]  %s796_s0, 128, %s21_s6, [#allocation3]  }
  0x23   :  { %s562_s11 = scalar_lea.vmem %s41_s1, 128  ;;  %p567_p2 = scmp.lt.s32.totalorder %s41_s1, %s41_s1 }
  0x24   :  { %p563_p1 = scmp.ne.s32.totalorder %s41_s1, %s562_s11  ;;  %p568_p3 = scmp.lt.s32.totalorder %s562_s11, %s562_s11 }
  0x26   :  { %p569_p4 = por %p568_p3, %p567_p2 }
  0x28   :  { %p570_p5 = pnand %p569_p4, %p563_p1 }
  0x2a   :  { %573 = shalt.err (!%p570_p5)
}
  0x2b   :  { %43 = dma.hbm_to_vmem [thread:$0]  %s798_s2, 128, %s41_s1, [#allocation6]  }
  0x2c   :  { %s628_s13 = smov [#allocation10]  }
  0x2d   :  { %s61_s14 = sshll.u32 %s628_s13, 4  ;;  %s62_s14 = int_to_ptr.vmem [resolvable:$true] %s61_s14 }
  0x2e   :  { %s582_s15 = scalar_lea.vmem %s62_s14, 256  ;;  %p587_p7 = scmp.lt.s32.totalorder %s62_s14, %s62_s14 }
  0x2f   :  { %p583_p6 = scmp.ne.s32.totalorder %s62_s14, %s582_s15  ;;  %p588_p8 = scmp.lt.s32.totalorder %s582_s15, %s582_s15 }
  0x31   :  { %p589_p9 = por %p588_p8, %p587_p7 }
  0x33   :  { %p590_p10 = pnand %p589_p9, %p583_p6 }
  0x35   :  { %593 = shalt.err (!%p590_p10)
}
  0x36   :  { %67 = dma.hbm_to_vmem [thread:$0]  %s800_s4, 256, %s62_s14, [#allocation9], %s624_s26, %s624_s26, %s625_s27  }
  0x37   :  { %614 = dma.done.wait [#allocation3], 128  }
  0x38   :  { %615 = vsyncadd [#allocation3], 4294967168 }
  0x39   :  { %616 = dma.done.wait [#allocation6], 256  }
  0x3a   :  { %617 = vsyncadd [#allocation6], 4294967040 }
  0x3b   :  { %618 = dma.done.wait [#allocation9], 512  }
  0x3c   :  { %619 = vsyncadd [#allocation9], 4294966784  ;;  %v99_v0 = vlaneseq  ;;  %v629_v1 = vmov 1966171168   ;;  %v687_v6 = vld [vmem:[#allocation7] sm:$0xff]  ;;  %v630_v16 = vmov 0  }
  0x3d   :  { %v97_v2 = vunpack.c.l.s4 %v629_v1  ;;  %v95_v8 = vcombine.high %v687_v6, %v687_v6  ;;  %v695_v19 = vld [vmem:[#allocation8] sm:$0xff]  ;;  %v161_v24 = vld [vmem:[#allocation8 + $0x8] sm:$0xff]  ;;  %v746_v56 = vld [vmem:[#allocation10] sm:$0xff]  ;;  %s631_s2 = smov [#allocation11]  }
  0x3e   :  { %v684_v3 = vshrl.u32 %v99_v0, 7  ;;  %v749_v60 = vld [vmem:[#allocation10 + $0x8] sm:$0xff]  ;;  %s464_s4 = sshll.u32 %s631_s2, 4  ;;  %s465_s4 = int_to_ptr.vmem [resolvable:$true] %s464_s4 }
  0x3f   :  { %v98_v4 = vunpack.c.0.s8 %v97_v2  ;;  %s594_s17 = scalar_lea.vmem %s465_s4, 128  ;;  %p599_p12 = scmp.lt.s32.totalorder %s465_s4, %s465_s4 }
  0x40   :  { %v693_v10 = vsub.s32 0, %v684_v3  ;;  %p595_p11 = scmp.ne.s32.totalorder %s465_s4, %s594_s17  ;;  %p600_p13 = scmp.lt.s32.totalorder %s594_s17, %s594_s17 }
  0x41   :  { %v101_v5 = vsub.s32 %v98_v4, %v684_v3 }
  0x42   :  { %p601_p0 = por %p600_p13, %p599_p12 }
  0x43   :  { %v102_v7 = vrot.slane %v687_v6, %v101_v5  ;;  %v109_v12 = vrot.slane %v95_v8, %v101_v5 }
  0x44   :  { %p602_p1 = pnand %p601_p0, %p595_p11 }
  0x45   :  { %v118_v9 = vrot.slane %v102_v7, %v101_v5  ;;  %v110_v11 = vcombine.high %v102_v7, %v102_v7  ;;  %v125_v15 = vrot.slane %v109_v12, %v101_v5  ;;  %v111_v18 = vcombine.high %v109_v12, %v109_v12 }
  0x47   :  { %vm152_vm0 = vcmp.ne.f32.partialorder %v118_v9, 0.0  ;;  %v132_v13 = vrot.slane %v110_v11, %v101_v5  ;;  %v140_v14 = vcombine.high %v118_v9, %v118_v9  ;;  %vm156_vm3 = vcmp.ne.f32.partialorder %v125_v15, 0.0 }
  0x48   :  { %v162_v17 = vsel %vm152_vm0, 1, %v630_v16  ;;  %v166_v28 = vsel %vm156_vm3, 1, %v630_v16  ;;  %v139_v29 = vrot.slane %v111_v18, %v101_v5  ;;  %v141_v35 = vcombine.high %v125_v15, %v125_v15  ;;  %v440_v5 = vld [vmem:[#allocation2] sm:$0xff] }
  0x49   :  { %v173_v20 = vrot.slane %v162_v17, %v693_v10  ;;  %vm153_vm1 = vcmp.ne.f32.partialorder %v132_v13, 0.0  ;;  %vm154_vm2 = vcmp.ne.f32.partialorder %v140_v14, 0.0  ;;  %v142_v23 = vcombine.high %v132_v13, %v132_v13 }
  0x4a   :  { %v163_v21 = vsel %vm153_vm1, 1, %v630_v16  ;;  %v164_v22 = vsel %vm154_vm2, 1, %v630_v16  ;;  %v189_v32 = vrot.slane %v166_v28, %v693_v10  ;;  %vm157_vm8 = vcmp.ne.f32.partialorder %v139_v29, 0.0 }
  0x4b   :  { %vm202_vm4 = vcmp.eq.s32.totalorder %v173_v20, 1  ;;  %v177_v25 = vrot.slane %v163_v21, %v693_v10  ;;  %v181_v26 = vrot.slane %v164_v22, %v693_v10  ;;  %vm155_vm6 = vcmp.ne.f32.partialorder %v142_v23, 0.0 }
  0x4c   :  { %v210_v27 = vsel %vm202_vm4, %v695_v19, inf  ;;  %v211_v30 = vsel %vm202_vm4, %v161_v24, inf  ;;  %v165_v34 = vsel %vm155_vm6, 1, %v630_v16  ;;  %vm206_vm9 = vcmp.eq.s32.totalorder %v189_v32, 1 }
  0x4d   :  { %226 = vmin.xlane.f32.xlu0 %v210_v27  ;;  %vm203_vm5 = vcmp.eq.s32.totalorder %v177_v25, 1  ;;  %vm204_vm7 = vcmp.eq.s32.totalorder %v181_v26, 1  ;;  %v185_v37 = vrot.slane %v165_v34, %v693_v10  ;;  %v167_v39 = vsel %vm157_vm8, 1, %v630_v16 }
  0x4e   :  { %v212_v31 = vsel %vm203_vm5, %v695_v19, inf  ;;  %v213_v33 = vsel %vm203_vm5, %v161_v24, inf  ;;  %v214_v36 = vsel %vm204_vm7, %v695_v19, inf  ;;  %v705_v38 = vsel %vm204_vm7, %v161_v24, inf }
  0x4f   :  { %230 = vmin.xlane.f32.xlu1 %v212_v31  ;;  %vm158_vm10 = vcmp.ne.f32.partialorder %v141_v35, 0.0  ;;  %v143_v40 = vcombine.high %v139_v29, %v139_v29  ;;  %v708_v41 = vsel %vm206_vm9, %v695_v19, inf  ;;  %vm205_vm11 = vcmp.eq.s32.totalorder %v185_v37, 1 }
  0x50   :  { %v193_v42 = vrot.slane %v167_v39, %v693_v10  ;;  %v712_v43 = vsel %vm206_vm9, %v161_v24, inf  ;;  %v168_v44 = vsel %vm158_vm10, 1, %v630_v16  ;;  %v716_v45 = vsel %vm205_vm11, %v695_v19, inf }
  0x51   :  { %228 = vmin.xlane.f32.xlu0 %v211_v30  ;;  %vm159_vm12 = vcmp.ne.f32.partialorder %v143_v40, 0.0  ;;  %v197_v46 = vrot.slane %v168_v44, %v693_v10  ;;  %v720_v47 = vsel %vm205_vm11, %v161_v24, inf  ;;  %v443_v9 = vand.u32 2147483647, %v440_v5 }
  0x52   :  { %vm207_vm13 = vcmp.eq.s32.totalorder %v193_v42, 1  ;;  %v169_v48 = vsel %vm159_vm12, 1, %v630_v16  ;;  %v441_v35 = vsub.f32 0.0, %v440_v5 }
  0x53   :  { %232 = vmin.xlane.f32.xlu1 %v213_v33  ;;  %v724_v49 = vsel %vm207_vm13, %v695_v19, inf  ;;  %vm208_vm14 = vcmp.eq.s32.totalorder %v197_v46, 1  ;;  %v201_v50 = vrot.slane %v169_v48, %v693_v10  ;;  %v728_v51 = vsel %vm207_vm13, %v161_v24, inf }
  0x54   :  { %v732_v52 = vsel %vm208_vm14, %v695_v19, inf  ;;  %v735_v53 = vsel %vm208_vm14, %v161_v24, inf  ;;  %v444_v12 = vsub.f32 0.0, %v443_v9  ;;  %v442_v37 = vmax.f32 %v441_v35, 0.0 }
  0x55   :  { %234 = vmin.xlane.f32.xlu0 %v214_v36  ;;  %vm209_vm15 = vcmp.eq.s32.totalorder %v201_v50, 1 }
  0x56   :  { %v739_v54 = vsel %vm209_vm15, %v695_v19, inf  ;;  %v742_v55 = vsel %vm209_vm15, %v161_v24, inf  ;;  %v445_v15 = vmul.f32 1.442695, %v444_v12 }
  0x57   :  { %236 = vmin.xlane.f32.xlu1 %v705_v38 }
  0x58   :  { %486 = vpow2.f32 %v445_v15 }
  0x59   :  { %242 = vmin.xlane.f32.xlu0 %v708_v41 }
  0x5b   :  { %244 = vmin.xlane.f32.xlu1 %v712_v43 }
  0x5d   :  { %238 = vmin.xlane.f32.xlu0 %v716_v45 }
  0x5f   :  { %240 = vmin.xlane.f32.xlu1 %v720_v47 }
  0x61   :  { %246 = vmin.xlane.f32.xlu0 %v724_v49 }
  0x63   :  { %248 = vmin.xlane.f32.xlu1 %v728_v51 }
  0x65   :  { %250 = vmin.xlane.f32.xlu0 %v732_v52 }
  0x67   :  { %252 = vmin.xlane.f32.xlu1 %v735_v53 }
  0x69   :  { %254 = vmin.xlane.f32.xlu0 %v739_v54 }
  0x6b   :  { %256 = vmin.xlane.f32.xlu1 %v742_v55 }
  0xd6   :  { %v227_v57 = vpop.xlane.xlu0 %226 }
  0xd7   :  { %vm258_vm0 = vcmp.eq.f32.partialorder %v210_v27, %v227_v57 }
  0xd8   :  { %v276_v58 = vsel %vm258_vm0, %v746_v56, 0.0  ;;  %v231_v59 = vpop.xlane.xlu1 %230  ;;  %vm351_vm0 = vcmask 130112  }
  0xd9   :  { %292 = vadd.xlane.f32.xlu0 %v276_v58  ;;  %vm260_vm1 = vcmp.eq.f32.partialorder %v212_v31, %v231_v59 }
  0xda   :  { %v229_v61 = vpop.xlane.xlu0 %228  ;;  %v278_v62 = vsel %vm260_vm1, %v746_v56, 0.0  ;;  %vm416_vm1 = vcmask 1041409  }
  0xdb   :  { %vm259_vm2 = vcmp.eq.f32.partialorder %v211_v30, %v229_v61  ;;  %v487_v30 = vpop.eup %486 }
  0xdc   :  { %v277_v63 = vsel %vm259_vm2, %v749_v60, 0.0  ;;  %v233_v1 = vpop.xlane.xlu1 %232  ;;  %vm418_vm2 = vcmask 1042434  }
  0xdd   :  { %294 = vadd.xlane.f32.xlu1 %v277_v63  ;;  %296 = vadd.xlane.f32.xlu0 %v278_v62  ;;  %vm261_vm3 = vcmp.eq.f32.partialorder %v213_v33, %v233_v1  ;;  %v447_v33 = vadd.f32 1.0, %v487_v30 }
  0xde   :  { %v279_v2 = vsel %vm261_vm3, %v749_v60, 0.0  ;;  %v235_v4 = vpop.xlane.xlu0 %234  ;;  %vm420_vm3 = vcmask 1043459  }
  0xdf   :  { %vm262_vm4 = vcmp.eq.f32.partialorder %v214_v36, %v235_v4  ;;  %488 = vlog2.f32 %v447_v33 }
  0xe0   :  { %v237_v7 = vpop.xlane.xlu1 %236  ;;  %v280_v8 = vsel %vm262_vm4, %v746_v56, 0.0  ;;  %vm422_vm4 = vcmask 1044484  }
  0xe1   :  { %298 = vadd.xlane.f32.xlu1 %v279_v2  ;;  %vm263_vm5 = vcmp.eq.f32.partialorder %v705_v38, %v237_v7  ;;  %300 = vadd.xlane.f32.xlu0 %v280_v8 }
  0xe2   :  { %v281_v10 = vsel %vm263_vm5, %v749_v60, 0.0  ;;  %v243_v11 = vpop.xlane.xlu0 %242  ;;  %vm424_vm5 = vcmask 1045509  }
  0xe3   :  { %vm266_vm6 = vcmp.eq.f32.partialorder %v708_v41, %v243_v11  ;;  %v778_v41 = vld [vmem:[#allocation5] sm:$0xff] }
  0xe4   :  { %v245_v13 = vpop.xlane.xlu1 %244  ;;  %v284_v14 = vsel %vm266_vm6, %v746_v56, 0.0  ;;  %v86_v42 = vand.u32 2147483647, %v778_v41  ;;  %vm426_vm6 = vcmask 1046534  }
  0xe5   :  { %302 = vadd.xlane.f32.xlu1 %v281_v10  ;;  %vm267_vm7 = vcmp.eq.f32.partialorder %v712_v43, %v245_v13  ;;  %308 = vadd.xlane.f32.xlu0 %v284_v14 }
  0xe6   :  { %v285_v16 = vsel %vm267_vm7, %v749_v60, 0.0  ;;  %v239_v17 = vpop.xlane.xlu0 %238  ;;  %v87_v43 = vsub.f32 0.0, %v86_v42  ;;  %vm428_vm7 = vcmask 1047559  }
  0xe7   :  { %vm264_vm8 = vcmp.eq.f32.partialorder %v716_v45, %v239_v17 }
  0xe8   :  { %v241_v18 = vpop.xlane.xlu1 %240  ;;  %v282_v19 = vsel %vm264_vm8, %v746_v56, 0.0  ;;  %v88_v44 = vmul.f32 1.442695, %v87_v43  ;;  %vm432_vm8 = vcmask 130048  }
  0xe9   :  { %310 = vadd.xlane.f32.xlu1 %v285_v16  ;;  %vm265_vm9 = vcmp.eq.f32.partialorder %v720_v47, %v241_v18  ;;  %304 = vadd.xlane.f32.xlu0 %v282_v19 }
  0xea   :  { %v283_v20 = vsel %vm265_vm9, %v749_v60, 0.0  ;;  %v247_v21 = vpop.xlane.xlu0 %246  ;;  %490 = vpow2.f32 %v88_v44 }
  0xeb   :  { %vm268_vm10 = vcmp.eq.f32.partialorder %v724_v49, %v247_v21 }
  0xec   :  { %v249_v22 = vpop.xlane.xlu1 %248  ;;  %v286_v23 = vsel %vm268_vm10, %v746_v56, 0.0  ;;  %v489_v36 = vpop.eup %488 }
  0xed   :  { %306 = vadd.xlane.f32.xlu1 %v283_v20  ;;  %vm269_vm11 = vcmp.eq.f32.partialorder %v728_v51, %v249_v22  ;;  %312 = vadd.xlane.f32.xlu0 %v286_v23  ;;  %v449_v38 = vmul.f32 0.6931472, %v489_v36  ;;  %v85_v23 = vmax.f32 %v778_v41, 0.0 }
  0xee   :  { %v287_v24 = vsel %vm269_vm11, %v749_v60, 0.0  ;;  %v251_v25 = vpop.xlane.xlu0 %250 }
  0xef   :  { %vm270_vm12 = vcmp.eq.f32.partialorder %v732_v52, %v251_v25  ;;  %v450_v39 = vadd.f32 %v449_v38, %v442_v37 }
  0xf0   :  { %v253_v26 = vpop.xlane.xlu1 %252  ;;  %v288_v27 = vsel %vm270_vm12, %v746_v56, 0.0 }
  0xf1   :  { %314 = vadd.xlane.f32.xlu1 %v287_v24  ;;  %vm271_vm13 = vcmp.eq.f32.partialorder %v735_v53, %v253_v26  ;;  %316 = vadd.xlane.f32.xlu0 %v288_v27  ;;  %v451_v40 = vmul.f32 %v450_v39, %v687_v6 }
  0xf2   :  { %v289_v28 = vsel %vm271_vm13, %v749_v60, 0.0  ;;  %v255_v29 = vpop.xlane.xlu0 %254 }
  0xf3   :  { %vm272_vm14 = vcmp.eq.f32.partialorder %v739_v54, %v255_v29  ;;  %v341_v54 = vand.u32 127, %v99_v0 }
  0xf4   :  { %v257_v31 = vpop.xlane.xlu1 %256  ;;  %v290_v32 = vsel %vm272_vm14, %v746_v56, 0.0 }
  0xf5   :  { %318 = vadd.xlane.f32.xlu1 %v289_v28  ;;  %vm273_vm15 = vcmp.eq.f32.partialorder %v742_v55, %v257_v31  ;;  %320 = vadd.xlane.f32.xlu0 %v290_v32  ;;  %v346_v6 = vadd.s32 4294967288, %v341_v54  ;;  %v344_v58 = vsub.s32 %v341_v54, %v684_v3 }
  0xf6   :  { %v291_v34 = vsel %vm273_vm15, %v749_v60, 0.0 }
  0xf7   :  { %v491_v48 = vpop.eup %490  ;;  %v349_v57 = vsub.s32 %v346_v6, %v684_v3 }
  0xf8   :  { %v90_v51 = vadd.f32 1.0, %v491_v48 }
  0xf9   :  { %322 = vadd.xlane.f32.xlu1 %v291_v34  ;;  %452 = vadd.xlane.f32.xlu0 %v451_v40 }
  0xfa   :  { %492 = vlog2.f32 %v90_v51 }
 0x107   :  { %v493_v10 = vpop.eup %492 }
 0x108   :  { %v92_v24 = vmul.f32 0.6931472, %v493_v10 }
 0x10a   :  { %v93_v33 = vadd.f32 %v92_v24, %v85_v23 }
 0x162   :  { %v293_v45 = vpop.xlane.xlu0 %292 }
 0x163   :  { %v345_v8 = vrot.slane %v293_v45, %v344_v58 }
 0x166   :  { %v295_v46 = vpop.xlane.xlu1 %294  ;;  %v297_v47 = vpop.xlane.xlu0 %296 }
 0x167   :  { %v350_v1 = vrot.slane %v295_v46, %v349_v57  ;;  %v356_v2 = vrot.slane %v297_v47, %v344_v58 }
 0x169   :  { %v352_v11 = vsel %vm351_vm0, %v350_v1, %v345_v8 }
 0x16a   :  { %v299_v49 = vpop.xlane.xlu1 %298  ;;  %v301_v50 = vpop.xlane.xlu0 %300 }
 0x16b   :  { %v360_v61 = vrot.slane %v299_v49, %v349_v57  ;;  %v365_v63 = vrot.slane %v301_v50, %v344_v58 }
 0x16d   :  { %v361_v9 = vsel %vm351_vm0, %v360_v61, %v356_v2 }
 0x16e   :  { %v303_v52 = vpop.xlane.xlu1 %302  ;;  %v309_v53 = vpop.xlane.xlu0 %308  ;;  %v417_v15 = vsel %vm416_vm1, %v361_v9, %v352_v11 }
 0x16f   :  { %v369_v62 = vrot.slane %v303_v52, %v349_v57  ;;  %v383_v17 = vrot.slane %v309_v53, %v344_v58 }
 0x171   :  { %v370_v3 = vsel %vm351_vm0, %v369_v62, %v365_v63 }
 0x172   :  { %v311_v55 = vpop.xlane.xlu1 %310  ;;  %v305_v56 = vpop.xlane.xlu0 %304  ;;  %v419_v21 = vsel %vm418_vm2, %v370_v3, %v417_v15 }
 0x173   :  { %v374_v5 = vrot.slane %v305_v56, %v344_v58  ;;  %v387_v16 = vrot.slane %v311_v55, %v349_v57 }
 0x175   :  { %v388_v28 = vsel %vm351_vm0, %v387_v16, %v383_v17 }
 0x176   :  { %v307_v59 = vpop.xlane.xlu1 %306  ;;  %v313_v60 = vpop.xlane.xlu0 %312 }
 0x177   :  { %v378_v4 = vrot.slane %v307_v59, %v349_v57  ;;  %v392_v14 = vrot.slane %v313_v60, %v344_v58 }
 0x179   :  { %v379_v12 = vsel %vm351_vm0, %v378_v4, %v374_v5 }
 0x17a   :  { %v315_v7 = vpop.xlane.xlu1 %314  ;;  %v317_v0 = vpop.xlane.xlu0 %316  ;;  %v421_v25 = vsel %vm420_vm3, %v379_v12, %v419_v21 }
 0x17b   :  { %v396_v13 = vrot.slane %v315_v7, %v349_v57  ;;  %v401_v19 = vrot.slane %v317_v0, %v344_v58  ;;  %v423_v31 = vsel %vm422_vm4, %v388_v28, %v421_v25 }
 0x17d   :  { %v397_v26 = vsel %vm351_vm0, %v396_v13, %v392_v14 }
 0x17e   :  { %v319_v18 = vpop.xlane.xlu1 %318  ;;  %v321_v20 = vpop.xlane.xlu0 %320  ;;  %v425_v34 = vsel %vm424_vm5, %v397_v26, %v423_v31 }
 0x17f   :  { %v405_v22 = vrot.slane %v319_v18, %v349_v57  ;;  %v410_v27 = vrot.slane %v321_v20, %v344_v58 }
 0x181   :  { %v406_v29 = vsel %vm351_vm0, %v405_v22, %v401_v19 }
 0x182   :  { %v323_v30 = vpop.xlane.xlu1 %322  ;;  %v427_v36 = vsel %vm426_vm6, %v406_v29, %v425_v34  ;;  %v453_v40 = vpop.xlane.xlu0 %452 }
 0x183   :  { %v414_v32 = vrot.slane %v323_v30, %v349_v57 }
 0x185   :  { %v415_v35 = vsel %vm351_vm0, %v414_v32, %v410_v27 }
 0x186   :  { %v429_v37 = vsel %vm428_vm7, %v415_v35, %v427_v36 }
 0x187   :  { %v431_v38 = vmul.f32 %v429_v37, %v93_v33 }
 0x189   :  { %v433_v39 = vsel %vm432_vm8, %v431_v38, 0.0 }
 0x18a   :  { %434 = vadd.xlane.f32.xlu1 %v433_v39 }
 0x213   :  { %v435_v41 = vpop.xlane.xlu1 %434 }
 0x214   :  { %v456_v42 = vadd.f32 %v453_v40, %v435_v41 }
 0x216   :  { %457 = vst [vmem:[#allocation11] sm:$0xff] %v456_v42 }
 0x217   :  { %605 = shalt.err (!%p602_p1)
}
 0x218   :  { %467 = dma.vmem_to_hbm [thread:$0]  %s465_s4, 128, %s801_s5, [#allocation4]  }
 0x219   :  { %620 = dma.done.wait [#allocation4], 128  }
 0x21a   :  { %621 = vsyncadd [#allocation4], 4294967168 }
 0x21b   :  { %471 = vsyncpa [#allocation3], 1 }
 0x21c   :  { %472 = vsyncpa [#allocation6], 1 }
 0x21d   :  { %473 = vsyncpa [#allocation9], 1 }
 0x21e   :  { %474 = vsyncpa [#allocation4], 1 }

// kernel: tpu_custom_call.1
= control target key start
LH: loop header
LB: loop body
LE: loop exit
PB: predicated region body
PF: predicated region fallthrough
CT: control target
= control target key end

     0   :  { %10 = vsyncpa [#allocation3], 0  ;;  %s796_s0 = inlined_call_operand.hbm [shape: f32[8,128], index: 0, kind: input, shape index: {}]   ;;  %s797_s1 = inlined_call_operand.hbm [shape: f32[8,128], index: 1, kind: input, shape index: {}]   ;;  %s798_s2 = inlined_call_operand.hbm [shape: f32[8,128], index: 2, kind: input, shape index: {}]   ;;  %s799_s3 = inlined_call_operand.hbm [shape: f32[16,128], index: 3, kind: input, shape index: {}]   ;;  %s800_s4 = inlined_call_operand.hbm [shape: f32[16,128], index: 4, kind: input, shape index: {}]   ;;  %s801_s5 = inlined_call_operand.hbm [shape: f32[8,128], index: 5, kind: output, shape index: {}]  }
   0x1   :  { %11 = vsyncpa [#allocation6], 0 }
   0x2   :  { %12 = vsyncpa [#allocation9], 0 }
   0x3   :  { %13 = vsyncpa [#allocation4], 0  ;;  %s622_s18 = smov [#allocation5]   ;;  %s623_s20 = smov [#allocation8]  }
   0x4   :  { %s30_s19 = sshll.u32 %s622_s18, 4  ;;  %s49_s21 = sshll.u32 %s623_s20, 4  ;;  %s31_s19 = int_to_ptr.vmem [resolvable:$true] %s30_s19  ;;  %s50_s21 = int_to_ptr.vmem [resolvable:$true] %s49_s21 }
   0x5   :  { %s502_s22 = scalar_lea.vmem %s31_s19, 128  ;;  %p507_p1 = scmp.lt.s32.totalorder %s31_s19, %s31_s19 }
   0x6   :  { %p503_p0 = scmp.ne.s32.totalorder %s31_s19, %s502_s22  ;;  %p508_p2 = scmp.lt.s32.totalorder %s502_s22, %s502_s22 }
   0x8   :  { %p509_p3 = por %p508_p2, %p507_p1 }
   0xa   :  { %p510_p4 = pnand %p509_p3, %p503_p0 }
   0xc   :  { %513 = shalt.err (!%p510_p4)
}
   0xd   :  { %33 = dma.hbm_to_vmem [thread:$0]  %s797_s1, 128, %s31_s19, [#allocation6]  }
   0xe   :  { %s522_s25 = scalar_lea.vmem %s50_s21, 256  ;;  %p527_p6 = scmp.lt.s32.totalorder %s50_s21, %s50_s21 }
   0xf   :  { %p523_p5 = scmp.ne.s32.totalorder %s50_s21, %s522_s25  ;;  %p528_p7 = scmp.lt.s32.totalorder %s522_s25, %s522_s25 }
  0x11   :  { %p529_p8 = por %p528_p7, %p527_p6 }
  0x13   :  { %p530_p9 = pnand %p529_p8, %p523_p5 }
  0x15   :  { %533 = shalt.err (!%p530_p9)
}
  0x16   :  { %s624_s26 = smov 128   ;;  %s625_s27 = smov 8  }
  0x17   :  { %55 = dma.hbm_to_vmem [thread:$0]  %s799_s3, 256, %s50_s21, [#allocation9], %s624_s26, %s624_s26, %s625_s27  }
  0x18   :  { %s626_s30 = smov [#allocation2]   ;;  %s627_s7 = smov [#allocation7]  }
  0x19   :  { %s20_s6 = sshll.u32 %s626_s30, 4  ;;  %s40_s1 = sshll.u32 %s627_s7, 4  ;;  %s21_s6 = int_to_ptr.vmem [resolvable:$true] %s20_s6  ;;  %s41_s1 = int_to_ptr.vmem [resolvable:$true] %s40_s1 }
  0x1a   :  { %s542_s8 = scalar_lea.vmem %s21_s6, 128  ;;  %p547_p11 = scmp.lt.s32.totalorder %s21_s6, %s21_s6 }
  0x1b   :  { %p543_p10 = scmp.ne.s32.totalorder %s21_s6, %s542_s8  ;;  %p548_p12 = scmp.lt.s32.totalorder %s542_s8, %s542_s8 }
  0x1d   :  { %p549_p13 = por %p548_p12, %p547_p11 }
  0x1f   :  { %p550_p0 = pnand %p549_p13, %p543_p10 }
  0x21   :  { %553 = shalt.err (!%p550_p0)
}
  0x22   :  { %23 = dma.hbm_to_vmem [thread:$0]  %s796_s0, 128, %s21_s6, [#allocation3]  }
  0x23   :  { %s562_s11 = scalar_lea.vmem %s41_s1, 128  ;;  %p567_p2 = scmp.lt.s32.totalorder %s41_s1, %s41_s1 }
  0x24   :  { %p563_p1 = scmp.ne.s32.totalorder %s41_s1, %s562_s11  ;;  %p568_p3 = scmp.lt.s32.totalorder %s562_s11, %s562_s11 }
  0x26   :  { %p569_p4 = por %p568_p3, %p567_p2 }
  0x28   :  { %p570_p5 = pnand %p569_p4, %p563_p1 }
  0x2a   :  { %573 = shalt.err (!%p570_p5)
}
  0x2b   :  { %43 = dma.hbm_to_vmem [thread:$0]  %s798_s2, 128, %s41_s1, [#allocation6]  }
  0x2c   :  { %s628_s13 = smov [#allocation10]  }
  0x2d   :  { %s61_s14 = sshll.u32 %s628_s13, 4  ;;  %s62_s14 = int_to_ptr.vmem [resolvable:$true] %s61_s14 }
  0x2e   :  { %s582_s15 = scalar_lea.vmem %s62_s14, 256  ;;  %p587_p7 = scmp.lt.s32.totalorder %s62_s14, %s62_s14 }
  0x2f   :  { %p583_p6 = scmp.ne.s32.totalorder %s62_s14, %s582_s15  ;;  %p588_p8 = scmp.lt.s32.totalorder %s582_s15, %s582_s15 }
  0x31   :  { %p589_p9 = por %p588_p8, %p587_p7 }
  0x33   :  { %p590_p10 = pnand %p589_p9, %p583_p6 }
  0x35   :  { %593 = shalt.err (!%p590_p10)
}
  0x36   :  { %67 = dma.hbm_to_vmem [thread:$0]  %s800_s4, 256, %s62_s14, [#allocation9], %s624_s26, %s624_s26, %s625_s27  }
  0x37   :  { %614 = dma.done.wait [#allocation3], 128  }
  0x38   :  { %615 = vsyncadd [#allocation3], 4294967168 }
  0x39   :  { %616 = dma.done.wait [#allocation6], 256  }
  0x3a   :  { %617 = vsyncadd [#allocation6], 4294967040 }
  0x3b   :  { %618 = dma.done.wait [#allocation9], 512  }
  0x3c   :  { %619 = vsyncadd [#allocation9], 4294966784  ;;  %v99_v0 = vlaneseq  ;;  %v629_v1 = vmov 1966171168   ;;  %v687_v6 = vld [vmem:[#allocation7] sm:$0xff]  ;;  %v630_v16 = vmov 0  }
  0x3d   :  { %v97_v2 = vunpack.c.l.s4 %v629_v1  ;;  %v95_v8 = vcombine.high %v687_v6, %v687_v6  ;;  %v695_v19 = vld [vmem:[#allocation8] sm:$0xff]  ;;  %v161_v24 = vld [vmem:[#allocation8 + $0x8] sm:$0xff]  ;;  %v746_v56 = vld [vmem:[#allocation10] sm:$0xff]  ;;  %s631_s2 = smov [#allocation11]  }
  0x3e   :  { %v684_v3 = vshrl.u32 %v99_v0, 7  ;;  %v749_v60 = vld [vmem:[#allocation10 + $0x8] sm:$0xff]  ;;  %s464_s4 = sshll.u32 %s631_s2, 4  ;;  %s465_s4 = int_to_ptr.vmem [resolvable:$true] %s464_s4 }
  0x3f   :  { %v98_v4 = vunpack.c.0.s8 %v97_v2  ;;  %s594_s17 = scalar_lea.vmem %s465_s4, 128  ;;  %p599_p12 = scmp.lt.s32.totalorder %s465_s4, %s465_s4 }
  0x40   :  { %v693_v10 = vsub.s32 0, %v684_v3  ;;  %p595_p11 = scmp.ne.s32.totalorder %s465_s4, %s594_s17  ;;  %p600_p13 = scmp.lt.s32.totalorder %s594_s17, %s594_s17 }
  0x41   :  { %v101_v5 = vsub.s32 %v98_v4, %v684_v3 }
  0x42   :  { %p601_p0 = por %p600_p13, %p599_p12 }
  0x43   :  { %v102_v7 = vrot.slane %v687_v6, %v101_v5  ;;  %v109_v12 = vrot.slane %v95_v8, %v101_v5 }
  0x44   :  { %p602_p1 = pnand %p601_p0, %p595_p11 }
  0x45   :  { %v118_v9 = vrot.slane %v102_v7, %v101_v5  ;;  %v110_v11 = vcombine.high %v102_v7, %v102_v7  ;;  %v125_v15 = vrot.slane %v109_v12, %v101_v5  ;;  %v111_v18 = vcombine.high %v109_v12, %v109_v12 }
  0x47   :  { %vm152_vm0 = vcmp.ne.f32.partialorder %v118_v9, 0.0  ;;  %v132_v13 = vrot.slane %v110_v11, %v101_v5  ;;  %v140_v14 = vcombine.high %v118_v9, %v118_v9  ;;  %vm156_vm3 = vcmp.ne.f32.partialorder %v125_v15, 0.0 }
  0x48   :  { %v162_v17 = vsel %vm152_vm0, 1, %v630_v16  ;;  %v166_v28 = vsel %vm156_vm3, 1, %v630_v16  ;;  %v139_v29 = vrot.slane %v111_v18, %v101_v5  ;;  %v141_v35 = vcombine.high %v125_v15, %v125_v15  ;;  %v440_v5 = vld [vmem:[#allocation2] sm:$0xff] }
  0x49   :  { %v173_v20 = vrot.slane %v162_v17, %v693_v10  ;;  %vm153_vm1 = vcmp.ne.f32.partialorder %v132_v13, 0.0  ;;  %vm154_vm2 = vcmp.ne.f32.partialorder %v140_v14, 0.0  ;;  %v142_v23 = vcombine.high %v132_v13, %v132_v13 }
  0x4a   :  { %v163_v21 = vsel %vm153_vm1, 1, %v630_v16  ;;  %v164_v22 = vsel %vm154_vm2, 1, %v630_v16  ;;  %v189_v32 = vrot.slane %v166_v28, %v693_v10  ;;  %vm157_vm8 = vcmp.ne.f32.partialorder %v139_v29, 0.0 }
  0x4b   :  { %vm202_vm4 = vcmp.eq.s32.totalorder %v173_v20, 1  ;;  %v177_v25 = vrot.slane %v163_v21, %v693_v10  ;;  %v181_v26 = vrot.slane %v164_v22, %v693_v10  ;;  %vm155_vm6 = vcmp.ne.f32.partialorder %v142_v23, 0.0 }
  0x4c   :  { %v210_v27 = vsel %vm202_vm4, %v695_v19, inf  ;;  %v211_v30 = vsel %vm202_vm4, %v161_v24, inf  ;;  %v165_v34 = vsel %vm155_vm6, 1, %v630_v16  ;;  %vm206_vm9 = vcmp.eq.s32.totalorder %v189_v32, 1 }
  0x4d   :  { %226 = vmin.xlane.f32.xlu0 %v210_v27  ;;  %vm203_vm5 = vcmp.eq.s32.totalorder %v177_v25, 1  ;;  %vm204_vm7 = vcmp.eq.s32.totalorder %v181_v26, 1  ;;  %v185_v37 = vrot.slane %v165_v34, %v693_v10  ;;  %v167_v39 = vsel %vm157_vm8, 1, %v630_v16 }
  0x4e   :  { %v212_v31 = vsel %vm203_vm5, %v695_v19, inf  ;;  %v213_v33 = vsel %vm203_vm5, %v161_v24, inf  ;;  %v214_v36 = vsel %vm204_vm7, %v695_v19, inf  ;;  %v705_v38 = vsel %vm204_vm7, %v161_v24, inf }
  0x4f   :  { %230 = vmin.xlane.f32.xlu1 %v212_v31  ;;  %vm158_vm10 = vcmp.ne.f32.partialorder %v141_v35, 0.0  ;;  %v143_v40 = vcombine.high %v139_v29, %v139_v29  ;;  %v708_v41 = vsel %vm206_vm9, %v695_v19, inf  ;;  %vm205_vm11 = vcmp.eq.s32.totalorder %v185_v37, 1 }
  0x50   :  { %v193_v42 = vrot.slane %v167_v39, %v693_v10  ;;  %v712_v43 = vsel %vm206_vm9, %v161_v24, inf  ;;  %v168_v44 = vsel %vm158_vm10, 1, %v630_v16  ;;  %v716_v45 = vsel %vm205_vm11, %v695_v19, inf }
  0x51   :  { %228 = vmin.xlane.f32.xlu0 %v211_v30  ;;  %vm159_vm12 = vcmp.ne.f32.partialorder %v143_v40, 0.0  ;;  %v197_v46 = vrot.slane %v168_v44, %v693_v10  ;;  %v720_v47 = vsel %vm205_vm11, %v161_v24, inf  ;;  %v443_v9 = vand.u32 2147483647, %v440_v5 }
  0x52   :  { %vm207_vm13 = vcmp.eq.s32.totalorder %v193_v42, 1  ;;  %v169_v48 = vsel %vm159_vm12, 1, %v630_v16  ;;  %v441_v35 = vsub.f32 0.0, %v440_v5 }
  0x53   :  { %232 = vmin.xlane.f32.xlu1 %v213_v33  ;;  %v724_v49 = vsel %vm207_vm13, %v695_v19, inf  ;;  %vm208_vm14 = vcmp.eq.s32.totalorder %v197_v46, 1  ;;  %v201_v50 = vrot.slane %v169_v48, %v693_v10  ;;  %v728_v51 = vsel %vm207_vm13, %v161_v24, inf }
  0x54   :  { %v732_v52 = vsel %vm208_vm14, %v695_v19, inf  ;;  %v735_v53 = vsel %vm208_vm14, %v161_v24, inf  ;;  %v444_v12 = vsub.f32 0.0, %v443_v9  ;;  %v442_v37 = vmax.f32 %v441_v35, 0.0 }
  0x55   :  { %234 = vmin.xlane.f32.xlu0 %v214_v36  ;;  %vm209_vm15 = vcmp.eq.s32.totalorder %v201_v50, 1 }
  0x56   :  { %v739_v54 = vsel %vm209_vm15, %v695_v19, inf  ;;  %v742_v55 = vsel %vm209_vm15, %v161_v24, inf  ;;  %v445_v15 = vmul.f32 1.442695, %v444_v12 }
  0x57   :  { %236 = vmin.xlane.f32.xlu1 %v705_v38 }
  0x58   :  { %486 = vpow2.f32 %v445_v15 }
  0x59   :  { %242 = vmin.xlane.f32.xlu0 %v708_v41 }
  0x5b   :  { %244 = vmin.xlane.f32.xlu1 %v712_v43 }
  0x5d   :  { %238 = vmin.xlane.f32.xlu0 %v716_v45 }
  0x5f   :  { %240 = vmin.xlane.f32.xlu1 %v720_v47 }
  0x61   :  { %246 = vmin.xlane.f32.xlu0 %v724_v49 }
  0x63   :  { %248 = vmin.xlane.f32.xlu1 %v728_v51 }
  0x65   :  { %250 = vmin.xlane.f32.xlu0 %v732_v52 }
  0x67   :  { %252 = vmin.xlane.f32.xlu1 %v735_v53 }
  0x69   :  { %254 = vmin.xlane.f32.xlu0 %v739_v54 }
  0x6b   :  { %256 = vmin.xlane.f32.xlu1 %v742_v55 }
  0xd6   :  { %v227_v57 = vpop.xlane.xlu0 %226 }
  0xd7   :  { %vm258_vm0 = vcmp.eq.f32.partialorder %v210_v27, %v227_v57 }
  0xd8   :  { %v276_v58 = vsel %vm258_vm0, %v746_v56, 0.0  ;;  %v231_v59 = vpop.xlane.xlu1 %230  ;;  %vm351_vm0 = vcmask 130112  }
  0xd9   :  { %292 = vadd.xlane.f32.xlu0 %v276_v58  ;;  %vm260_vm1 = vcmp.eq.f32.partialorder %v212_v31, %v231_v59 }
  0xda   :  { %v229_v61 = vpop.xlane.xlu0 %228  ;;  %v278_v62 = vsel %vm260_vm1, %v746_v56, 0.0  ;;  %vm416_vm1 = vcmask 1041409  }
  0xdb   :  { %vm259_vm2 = vcmp.eq.f32.partialorder %v211_v30, %v229_v61  ;;  %v487_v30 = vpop.eup %486 }
  0xdc   :  { %v277_v63 = vsel %vm259_vm2, %v749_v60, 0.0  ;;  %v233_v1 = vpop.xlane.xlu1 %232  ;;  %vm418_vm2 = vcmask 1042434  }
  0xdd   :  { %294 = vadd.xlane.f32.xlu1 %v277_v63  ;;  %296 = vadd.xlane.f32.xlu0 %v278_v62  ;;  %vm261_vm3 = vcmp.eq.f32.partialorder %v213_v33, %v233_v1  ;;  %v447_v33 = vadd.f32 1.0, %v487_v30 }
  0xde   :  { %v279_v2 = vsel %vm261_vm3, %v749_v60, 0.0  ;;  %v235_v4 = vpop.xlane.xlu0 %234  ;;  %vm420_vm3 = vcmask 1043459  }
  0xdf   :  { %vm262_vm4 = vcmp.eq.f32.partialorder %v214_v36, %v235_v4  ;;  %488 = vlog2.f32 %v447_v33 }
  0xe0   :  { %v237_v7 = vpop.xlane.xlu1 %236  ;;  %v280_v8 = vsel %vm262_vm4, %v746_v56, 0.0  ;;  %vm422_vm4 = vcmask 1044484  }
  0xe1   :  { %298 = vadd.xlane.f32.xlu1 %v279_v2  ;;  %vm263_vm5 = vcmp.eq.f32.partialorder %v705_v38, %v237_v7  ;;  %300 = vadd.xlane.f32.xlu0 %v280_v8 }
  0xe2   :  { %v281_v10 = vsel %vm263_vm5, %v749_v60, 0.0  ;;  %v243_v11 = vpop.xlane.xlu0 %242  ;;  %vm424_vm5 = vcmask 1045509  }
  0xe3   :  { %vm266_vm6 = vcmp.eq.f32.partialorder %v708_v41, %v243_v11  ;;  %v778_v41 = vld [vmem:[#allocation5] sm:$0xff] }
  0xe4   :  { %v245_v13 = vpop.xlane.xlu1 %244  ;;  %v284_v14 = vsel %vm266_vm6, %v746_v56, 0.0  ;;  %v86_v42 = vand.u32 2147483647, %v778_v41  ;;  %vm426_vm6 = vcmask 1046534  }
  0xe5   :  { %302 = vadd.xlane.f32.xlu1 %v281_v10  ;;  %vm267_vm7 = vcmp.eq.f32.partialorder %v712_v43, %v245_v13  ;;  %308 = vadd.xlane.f32.xlu0 %v284_v14 }
  0xe6   :  { %v285_v16 = vsel %vm267_vm7, %v749_v60, 0.0  ;;  %v239_v17 = vpop.xlane.xlu0 %238  ;;  %v87_v43 = vsub.f32 0.0, %v86_v42  ;;  %vm428_vm7 = vcmask 1047559  }
  0xe7   :  { %vm264_vm8 = vcmp.eq.f32.partialorder %v716_v45, %v239_v17 }
  0xe8   :  { %v241_v18 = vpop.xlane.xlu1 %240  ;;  %v282_v19 = vsel %vm264_vm8, %v746_v56, 0.0  ;;  %v88_v44 = vmul.f32 1.442695, %v87_v43  ;;  %vm432_vm8 = vcmask 130048  }
  0xe9   :  { %310 = vadd.xlane.f32.xlu1 %v285_v16  ;;  %vm265_vm9 = vcmp.eq.f32.partialorder %v720_v47, %v241_v18  ;;  %304 = vadd.xlane.f32.xlu0 %v282_v19 }
  0xea   :  { %v283_v20 = vsel %vm265_vm9, %v749_v60, 0.0  ;;  %v247_v21 = vpop.xlane.xlu0 %246  ;;  %490 = vpow2.f32 %v88_v44 }
  0xeb   :  { %vm268_vm10 = vcmp.eq.f32.partialorder %v724_v49, %v247_v21 }
  0xec   :  { %v249_v22 = vpop.xlane.xlu1 %248  ;;  %v286_v23 = vsel %vm268_vm10, %v746_v56, 0.0  ;;  %v489_v36 = vpop.eup %488 }
  0xed   :  { %306 = vadd.xlane.f32.xlu1 %v283_v20  ;;  %vm269_vm11 = vcmp.eq.f32.partialorder %v728_v51, %v249_v22  ;;  %312 = vadd.xlane.f32.xlu0 %v286_v23  ;;  %v449_v38 = vmul.f32 0.6931472, %v489_v36  ;;  %v85_v23 = vmax.f32 %v778_v41, 0.0 }
  0xee   :  { %v287_v24 = vsel %vm269_vm11, %v749_v60, 0.0  ;;  %v251_v25 = vpop.xlane.xlu0 %250 }
  0xef   :  { %vm270_vm12 = vcmp.eq.f32.partialorder %v732_v52, %v251_v25  ;;  %v450_v39 = vadd.f32 %v449_v38, %v442_v37 }
  0xf0   :  { %v253_v26 = vpop.xlane.xlu1 %252  ;;  %v288_v27 = vsel %vm270_vm12, %v746_v56, 0.0 }
  0xf1   :  { %314 = vadd.xlane.f32.xlu1 %v287_v24  ;;  %vm271_vm13 = vcmp.eq.f32.partialorder %v735_v53, %v253_v26  ;;  %316 = vadd.xlane.f32.xlu0 %v288_v27  ;;  %v451_v40 = vmul.f32 %v450_v39, %v687_v6 }
  0xf2   :  { %v289_v28 = vsel %vm271_vm13, %v749_v60, 0.0  ;;  %v255_v29 = vpop.xlane.xlu0 %254 }
  0xf3   :  { %vm272_vm14 = vcmp.eq.f32.partialorder %v739_v54, %v255_v29  ;;  %v341_v54 = vand.u32 127, %v99_v0 }
  0xf4   :  { %v257_v31 = vpop.xlane.xlu1 %256  ;;  %v290_v32 = vsel %vm272_vm14, %v746_v56, 0.0 }
  0xf5   :  { %318 = vadd.xlane.f32.xlu1 %v289_v28  ;;  %vm273_vm15 = vcmp.eq.f32.partialorder %v742_v55, %v257_v31  ;;  %320 = vadd.xlane.f32.xlu0 %v290_v32  ;;  %v346_v6 = vadd.s32 4294967288, %v341_v54  ;;  %v344_v58 = vsub.s32 %v341_v54, %v684_v3 }
  0xf6   :  { %v291_v34 = vsel %vm273_vm15, %v749_v60, 0.0 }
  0xf7   :  { %v491_v48 = vpop.eup %490  ;;  %v349_v57 = vsub.s32 %v346_v6, %v684_v3 }
  0xf8   :  { %v90_v51 = vadd.f32 1.0, %v491_v48 }
  0xf9   :  { %322 = vadd.xlane.f32.xlu1 %v291_v34  ;;  %452 = vadd.xlane.f32.xlu0 %v451_v40 }
  0xfa   :  { %492 = vlog2.f32 %v90_v51 }
 0x107   :  { %v493_v10 = vpop.eup %492 }
 0x108   :  { %v92_v24 = vmul.f32 0.6931472, %v493_v10 }
 0x10a   :  { %v93_v33 = vadd.f32 %v92_v24, %v85_v23 }
 0x162   :  { %v293_v45 = vpop.xlane.xlu0 %292 }
 0x163   :  { %v345_v8 = vrot.slane %v293_v45, %v344_v58 }
 0x166   :  { %v295_v46 = vpop.xlane.xlu1 %294  ;;  %v297_v47 = vpop.xlane.xlu0 %296 }
 0x167   :  { %v350_v1 = vrot.slane %v295_v46, %v349_v57  ;;  %v356_v2 = vrot.slane %v297_v47, %v344_v58 }
 0x169   :  { %v352_v11 = vsel %vm351_vm0, %v350_v1, %v345_v8 }
 0x16a   :  { %v299_v49 = vpop.xlane.xlu1 %298  ;;  %v301_v50 = vpop.xlane.xlu0 %300 }
 0x16b   :  { %v360_v61 = vrot.slane %v299_v49, %v349_v57  ;;  %v365_v63 = vrot.slane %v301_v50, %v344_v58 }
 0x16d   :  { %v361_v9 = vsel %vm351_vm0, %v360_v61, %v356_v2 }
 0x16e   :  { %v303_v52 = vpop.xlane.xlu1 %302  ;;  %v309_v53 = vpop.xlane.xlu0 %308  ;;  %v417_v15 = vsel %vm416_vm1, %v361_v9, %v352_v11 }
 0x16f   :  { %v369_v62 = vrot.slane %v303_v52, %v349_v57  ;;  %v383_v17 = vrot.slane %v309_v53, %v344_v58 }
 0x171   :  { %v370_v3 = vsel %vm351_vm0, %v369_v62, %v365_v63 }
 0x172   :  { %v311_v55 = vpop.xlane.xlu1 %310  ;;  %v305_v56 = vpop.xlane.xlu0 %304  ;;  %v419_v21 = vsel %vm418_vm2, %v370_v3, %v417_v15 }
 0x173   :  { %v374_v5 = vrot.slane %v305_v56, %v344_v58  ;;  %v387_v16 = vrot.slane %v311_v55, %v349_v57 }
 0x175   :  { %v388_v28 = vsel %vm351_vm0, %v387_v16, %v383_v17 }
 0x176   :  { %v307_v59 = vpop.xlane.xlu1 %306  ;;  %v313_v60 = vpop.xlane.xlu0 %312 }
 0x177   :  { %v378_v4 = vrot.slane %v307_v59, %v349_v57  ;;  %v392_v14 = vrot.slane %v313_v60, %v344_v58 }
 0x179   :  { %v379_v12 = vsel %vm351_vm0, %v378_v4, %v374_v5 }
 0x17a   :  { %v315_v7 = vpop.xlane.xlu1 %314  ;;  %v317_v0 = vpop.xlane.xlu0 %316  ;;  %v421_v25 = vsel %vm420_vm3, %v379_v12, %v419_v21 }
 0x17b   :  { %v396_v13 = vrot.slane %v315_v7, %v349_v57  ;;  %v401_v19 = vrot.slane %v317_v0, %v344_v58  ;;  %v423_v31 = vsel %vm422_vm4, %v388_v28, %v421_v25 }
 0x17d   :  { %v397_v26 = vsel %vm351_vm0, %v396_v13, %v392_v14 }
 0x17e   :  { %v319_v18 = vpop.xlane.xlu1 %318  ;;  %v321_v20 = vpop.xlane.xlu0 %320  ;;  %v425_v34 = vsel %vm424_vm5, %v397_v26, %v423_v31 }
 0x17f   :  { %v405_v22 = vrot.slane %v319_v18, %v349_v57  ;;  %v410_v27 = vrot.slane %v321_v20, %v344_v58 }
 0x181   :  { %v406_v29 = vsel %vm351_vm0, %v405_v22, %v401_v19 }
 0x182   :  { %v323_v30 = vpop.xlane.xlu1 %322  ;;  %v427_v36 = vsel %vm426_vm6, %v406_v29, %v425_v34  ;;  %v453_v40 = vpop.xlane.xlu0 %452 }
 0x183   :  { %v414_v32 = vrot.slane %v323_v30, %v349_v57 }
 0x185   :  { %v415_v35 = vsel %vm351_vm0, %v414_v32, %v410_v27 }
 0x186   :  { %v429_v37 = vsel %vm428_vm7, %v415_v35, %v427_v36 }
 0x187   :  { %v431_v38 = vmul.f32 %v429_v37, %v93_v33 }
 0x189   :  { %v433_v39 = vsel %vm432_vm8, %v431_v38, 0.0 }
 0x18a   :  { %434 = vadd.xlane.f32.xlu1 %v433_v39 }
 0x213   :  { %v435_v41 = vpop.xlane.xlu1 %434 }
 0x214   :  { %v456_v42 = vadd.f32 %v453_v40, %v435_v41 }
 0x216   :  { %457 = vst [vmem:[#allocation11] sm:$0xff] %v456_v42 }
 0x217   :  { %605 = shalt.err (!%p602_p1)
}
 0x218   :  { %467 = dma.vmem_to_hbm [thread:$0]  %s465_s4, 128, %s801_s5, [#allocation4]  }
 0x219   :  { %620 = dma.done.wait [#allocation4], 128  }
 0x21a   :  { %621 = vsyncadd [#allocation4], 4294967168 }
 0x21b   :  { %471 = vsyncpa [#allocation3], 1 }
 0x21c   :  { %472 = vsyncpa [#allocation6], 1 }
 0x21d   :  { %473 = vsyncpa [#allocation9], 1 }
 0x21e   :  { %474 = vsyncpa [#allocation4], 1 }

</bundles_post_ra>
